<compile_context>
chip_gen: v7x
topology: tpu7x:2x2x1
jax: 0.10.0
libtpu: 0.0.40
codegen_flags: <defaults>
</compile_context>

<pallas_src>
import functools
import math

import jax
import jax.numpy as jnp
from jax import lax
from jax.experimental import pallas as pl
from jax.experimental.pallas import tpu as pltpu


def _round_up(x, m):
    return ((x + m - 1) // m) * m


def _vmem_budget_bytes():
    """Per-core VMEM budget: ~75% of physical (compiler headroom / pipeline slack),
    capped at 100 MiB so v5e/v6e (128 MiB) also keep slack; 48 MiB fallback."""
    cap = 64 * 1024 * 1024
    try:
        info = pltpu.get_tpu_info()
        cap = int(getattr(info, "vmem_capacity_bytes", cap))
    except Exception:
        pass
    return min(int(cap * 0.75), 100 * 1024 * 1024)


def _vmem_need_bytes(hw_tile, K_pad, C_out, const_bufs=2):
    """Every VMEM consumer of the kernel below.  const_bufs=2 is the conservative
    (non-Buffered(1)) assumption so the fallback path always fits too."""
    resident = const_bufs * (C_out * K_pad * 4 + C_out * 4)   # wflat f32 + act bias
    resident += 2 * (K_pad * 4)                               # per-sample style vector (dbl buf)
    scratch = C_out * K_pad * 2                               # modulated weight scratch, bf16
    streamed = 2 * (K_pad * hw_tile * 2)                      # patches tile, bf16, dbl buf
    streamed += 2 * (hw_tile * 4)                             # noise tile, f32
    streamed += 2 * (C_out * hw_tile * 4)                     # output tile, f32
    return resident + scratch + streamed


def _pick_hw_tile(HW, K_pad, C_out, budget_bytes):
    """Largest lane-dense (multiple of 128) HW tile under the VMEM budget; prefer
    tiles that divide HW exactly so HW_pad == HW (no pad/slice HBM passes)."""
    hw_cap = _round_up(HW, 128)
    cands = [t for t in range(128, hw_cap + 1, 128) if HW % t == 0]
    if not cands:                       # HW not a multiple of 128 -> padded tiles
        cands = list(range(128, hw_cap + 1, 128))
    best = cands[0]
    for t in cands:
        if _vmem_need_bytes(t, K_pad, C_out) <= budget_bytes:
            best = t
    return best


def styled_conv_kernel(s_ref, wflat_ref, patches_ref, noise_ref, abias_ref, nw_ref,
                       out_ref, w_scratch, *, demodulate):
    hw_idx = pl.program_id(1)

    # ---- per-sample weight modulation: run once per batch item (hw tile 0) and
    #      cached in VMEM scratch (bf16) for every other HW tile of this sample.
    #      Invariant: the HW grid axis is the inner, sequential ("arbitrary") axis;
    #      do NOT mark it "parallel" without precomputing the weight in the wrapper.
    @pl.when(hw_idx == 0)
    def _():
        w = wflat_ref[...] * s_ref[...]                                   # (C_out, K_pad)
        if demodulate:
            d = lax.rsqrt(jnp.sum(w * w, axis=1, keepdims=True) + 1e-8)   # (C_out, 1)
            w = w * d
        w_scratch[...] = w.astype(w_scratch.dtype)                        # bf16 for the MXU

    # ---- modulated conv tile: (C_out, K_pad) @ (K_pad, hw_tile), bf16 x bf16,
    #      f32 accumulation (native MXU path). ----
    out = jnp.dot(w_scratch[...], patches_ref[...],
                  preferred_element_type=jnp.float32)                     # (C_out, hw_tile)

    # ---- noise injection: out + weight * noise (scalar weight from SMEM) ----
    out = out + nw_ref[0] * noise_ref[...]                                # (1, hw_tile) bcast

    # ---- FusedLeakyReLU: leaky_relu(out + bias, 0.2) * sqrt(2) ----
    out = out + abias_ref[...]                                            # (C_out, 1) bcast
    out = jnp.where(out >= 0.0, out, 0.2 * out) * jnp.float32(math.sqrt(2.0))

    out_ref[...] = out.astype(out_ref.dtype)


def styled_conv_forward(x, style, params, noise, *, kernel_size=3, demodulate=True,
                        hw_tile=None):
    B, C_in, H, W = x.shape
    k = kernel_size
    p = k // 2
    C_out = params["conv_weight"].shape[1]
    style_dim = style.shape[1]
    kk = k * k
    HW = H * W

    K = kk * C_in
    K_pad = _round_up(K, 16)           # bf16 sublane packing on the contraction axis

    budget = _vmem_budget_bytes()
    if hw_tile is None:
        hw_tile = _pick_hw_tile(HW, K_pad, C_out, budget)
    HW_pad = _round_up(HW, hw_tile)
    n_hw = HW_pad // hw_tile

    # ---- EqualLinear style modulation: tiny (B,S)x(S,C_in) matmul, precomputed in
    #      the wrapper so no (kk-times tiled) modulation weight is resident in VMEM.
    #      Tap-major / channel-minor tiling matches wflat & patches layouts. ----
    mod_scale = 1.0 / math.sqrt(style_dim)
    s = jnp.dot(style, (params["mod_weight"] * mod_scale).T,
                precision=lax.Precision.HIGHEST) + params["mod_bias"]      # (B, C_in)
    s_tiled = jnp.pad(jnp.tile(s, (1, kk)), ((0, 0), (0, K_pad - K)))
    s_tiled = s_tiled.reshape(B, 1, K_pad).astype(jnp.float32)

    # ---- conv weight: scale, flatten tap-major / channel-minor, zero-pad K -> K_pad.
    conv_scale = 1.0 / math.sqrt(C_in * kk)
    w0 = params["conv_weight"][0]                                          # (C_out, C_in, k, k)
    wflat = (conv_scale * jnp.transpose(w0, (0, 2, 3, 1))).reshape(C_out, K)
    wflat = jnp.pad(wflat, ((0, 0), (0, K_pad - K))).astype(jnp.float32)

    # ---- im2col (pure data rearrangement; all FLOPs stay in the kernel).  Cast to
    #      bf16 BEFORE stacking so every wrapper intermediate is half-width. ----
    xpad = jnp.pad(x.astype(jnp.bfloat16), ((0, 0), (0, 0), (p, p), (p, p)))
    patches = jnp.stack(
        [xpad[:, :, i:i + H, j:j + W] for i in range(k) for j in range(k)], axis=1
    ).reshape(B, K, HW)                                                    # (B, K, HW) bf16
    if K_pad > K or HW_pad > HW:
        patches = jnp.pad(patches, ((0, 0), (0, K_pad - K), (0, HW_pad - HW)))

    noise_flat = noise.reshape(B, 1, HW).astype(jnp.float32)
    if HW_pad > HW:
        noise_flat = jnp.pad(noise_flat, ((0, 0), (0, 0), (0, HW_pad - HW)))

    abias = params["act_bias"].reshape(C_out, 1).astype(jnp.float32)
    nw = params["noise_weight"].reshape(1).astype(jnp.float32)             # SMEM scalar

    kern = functools.partial(styled_conv_kernel, demodulate=demodulate)

    need = _vmem_need_bytes(hw_tile, K_pad, C_out)
    vmem_limit = int(min(max(need * 5 // 4, 16 * 1024 * 1024), budget))
    vmem_limit = max(vmem_limit, need + (1 << 20))    # never declare less than required

    def build(single_buffer_consts):
        def const_spec(block_shape, index_map):
            # Constant-index operands are never re-fetched: single-buffer them to
            # halve their VMEM residency (big win for 512-channel layers on v7x).
            if single_buffer_consts:
                return pl.BlockSpec(block_shape, index_map, pipeline_mode=pl.Buffered(1))
            return pl.BlockSpec(block_shape, index_map)

        return pl.pallas_call(
            kern,
            out_shape=jax.ShapeDtypeStruct((B, C_out, HW_pad), jnp.float32),
            grid_spec=pltpu.PrefetchScalarGridSpec(
                num_scalar_prefetch=0,
                grid=(B, n_hw),
                in_specs=[
                    pl.BlockSpec((None, 1, K_pad), lambda b, h: (b, 0, 0)),        # style vec
                    const_spec((C_out, K_pad), lambda b, h: (0, 0)),               # conv weight flat
                    pl.BlockSpec((None, K_pad, hw_tile), lambda b, h: (b, 0, h)),  # patches tile
                    pl.BlockSpec((None, 1, hw_tile), lambda b, h: (b, 0, h)),      # noise tile
                    const_spec((C_out, 1), lambda b, h: (0, 0)),                   # act bias
                    pl.BlockSpec(memory_space=pltpu.MemorySpace.SMEM),             # noise weight scalar
                ],
                out_specs=pl.BlockSpec((None, C_out, hw_tile), lambda b, h: (b, 0, h)),
                scratch_shapes=[pltpu.VMEM((C_out, K_pad), jnp.bfloat16)],         # modulated weight
            ),
            compiler_params=pltpu.CompilerParams(
                # B parallel (megacore); HW must stay sequential per sample because
                # the modulated-weight scratch is filled at hw==0 and reused after.
                dimension_semantics=("parallel", "arbitrary"),
                vmem_limit_bytes=vmem_limit,
            ),
        )

    args = (s_tiled, wflat, patches, noise_flat, abias, nw)
    try:
        out_flat = build(True)(*args)
    except Exception:
        # pl.Buffered(1) single-buffering unsupported in this jax build -> fall back
        # to default double-buffered pipelining (accounted for in _vmem_need_bytes).
        out_flat = build(False)(*args)

    if HW_pad > HW:
        out_flat = out_flat[:, :, :HW]
    return out_flat.reshape(B, C_out, H, W)


def styled_conv_reference(x, style, params, noise, *, kernel_size=3, demodulate=True):
    """Pure-JAX reference matching the PyTorch fused forward path (conv operands
    cast to bf16 to mirror the kernel's MXU dtype, f32 accumulation)."""
    B, C_in, H, W = x.shape
    k = kernel_size
    p = k // 2
    weight = params["conv_weight"]                                         # (1, C_out, C_in, k, k)
    C_out = weight.shape[1]
    style_dim = style.shape[1]

    mod_scale = 1.0 / math.sqrt(style_dim)
    s = jnp.dot(style, (params["mod_weight"] * mod_scale).T,
                precision=lax.Precision.HIGHEST) + params["mod_bias"]      # (B, C_in)

    conv_scale = 1.0 / math.sqrt(C_in * k * k)
    w = conv_scale * weight * s[:, None, :, None, None]                    # (B, C_out, C_in, k, k)
    if demodulate:
        d = lax.rsqrt(jnp.sum(w * w, axis=(2, 3, 4)) + 1e-8)
        w = w * d[:, :, None, None, None]

    w_bf = w.astype(jnp.bfloat16)
    x_bf = x.astype(jnp.bfloat16)

    def conv_one(xb, wb):
        return lax.conv_general_dilated(
            xb[None], wb, window_strides=(1, 1), padding=[(p, p), (p, p)],
            dimension_numbers=("NCHW", "OIHW", "NCHW"),
            preferred_element_type=jnp.float32)[0]

    out = jax.vmap(conv_one)(x_bf, w_bf)                                   # (B, C_out, H, W) f32
    out = out + params["noise_weight"].reshape(1, 1, 1, 1) * noise
    out = out + params["act_bias"].reshape(1, C_out, 1, 1)
    out = jnp.where(out >= 0.0, out, 0.2 * out) * math.sqrt(2.0)
    return out


if __name__ == "__main__":
    B, C_in, C_out, ksize, style_dim, H, W = 2, 4, 8, 3, 8, 16, 16

    key = jax.random.PRNGKey(0)
    k1, k2, k3, k4, k5, k6 = jax.random.split(key, 6)

    # __init__-shaped parameters (noise_weight / act_bias are nonzero here so the
    # noise-injection and bias paths are actually exercised; PyTorch init is zeros).
    params = {
        "conv_weight": jax.random.normal(k1, (1, C_out, C_in, ksize, ksize), jnp.float32),
        "mod_weight": jax.random.normal(k2, (C_in, style_dim), jnp.float32),   # EqualLinear(style_dim, C_in)
        "mod_bias": jnp.ones((C_in,), jnp.float32),                            # bias_init=1
        "noise_weight": jnp.full((1,), 0.3, jnp.float32),
        "act_bias": 0.1 * jax.random.normal(k6, (C_out,), jnp.float32),
    }

    x = jax.random.normal(k3, (B, C_in, H, W), jnp.float32)
    style = jax.random.normal(k4, (B, style_dim), jnp.float32)
    # torch draws noise ~ N(0,1) inside forward when noise is None; we pass an
    # explicit deterministic noise tensor of the same shape instead.
    noise = jax.random.normal(k5, (B, 1, H, W), jnp.float32)

    ref = styled_conv_reference(x, style, params, noise, kernel_size=ksize, demodulate=True)

    # Auto tile (divides HW exactly -> single HW tile here).
    out_auto = jax.block_until_ready(
        styled_conv_forward(x, style, params, noise, kernel_size=ksize, demodulate=True))
    assert out_auto.shape == (B, C_out, H, W)
    err_auto = float(jnp.max(jnp.abs(out_auto - ref)))
    assert jnp.allclose(out_auto, ref, rtol=1e-2, atol=1e-2), f"max abs err {err_auto}"

    # Forced hw_tile=128 exercises the multi-HW-tile path (HW=256 -> 2 tiles/sample,
    # i.e. the per-sample modulated-weight scratch reuse).
    out_tiled = jax.block_until_ready(
        styled_conv_forward(x, style, params, noise, kernel_size=ksize, demodulate=True,
                            hw_tile=128))
    err_tiled = float(jnp.max(jnp.abs(out_tiled - ref)))
    assert jnp.allclose(out_tiled, ref, rtol=1e-2, atol=1e-2), f"max abs err {err_tiled}"

    print("KERNEL_OK")
</pallas_src>

<mosaic_0001>
module attributes {stable_mosaic.version = 11 : i64} {
  func.func @styled_conv_kernel(%arg0: i32, %arg1: i32, %arg2: memref<1x1x48xf32, #tpu.memory_space<vmem>>, %arg3: memref<8x48xf32, #tpu.memory_space<vmem>>, %arg4: memref<1x48x256xbf16, #tpu.memory_space<vmem>>, %arg5: memref<1x1x256xf32, #tpu.memory_space<vmem>>, %arg6: memref<8x1xf32, #tpu.memory_space<vmem>>, %arg7: memref<1xf32, #tpu.memory_space<smem>>, %arg8: memref<1x8x256xf32, #tpu.memory_space<vmem>>, %arg9: memref<8x48xbf16, #tpu.memory_space<vmem>>) attributes {dimension_semantics = [#tpu.dimension_semantics<parallel>, #tpu.dimension_semantics<arbitrary>], iteration_bounds = array<i64: 2, 1>, scalar_prefetch = 0 : i64, scratch_operands = 1 : i64, tpu.core_type = #tpu.core_type<tc>, window_params = [{transform_indices = @transform_0, window_bounds = array<i64: 1, 1, 48>}, {pipeline_mode = #tpu.pipeline_mode<synchronous>, transform_indices = @transform_1, window_bounds = array<i64: 8, 48>}, {transform_indices = @transform_2, window_bounds = array<i64: 1, 48, 256>}, {transform_indices = @transform_3, window_bounds = array<i64: 1, 1, 256>}, {pipeline_mode = #tpu.pipeline_mode<synchronous>, transform_indices = @transform_4, window_bounds = array<i64: 8, 1>}, {transform_indices = @transform_5, window_bounds = array<i64: 1>}, {transform_indices = @transform_6, window_bounds = array<i64: 1, 8, 256>}]} {
    %c0_i32 = arith.constant 0 : i32
    %0 = arith.cmpi eq, %arg1, %c0_i32 : i32
    %1 = arith.extui %0 : i1 to i32
    %c0_i32_0 = arith.constant 0 : i32
    %2 = arith.cmpi ne, %1, %c0_i32_0 : i32
    scf.if %2 {
      %c0_17 = arith.constant 0 : index
      %c0_18 = arith.constant 0 : index
      %27 = vector.load %arg3[%c0_17, %c0_18] : memref<8x48xf32, #tpu.memory_space<vmem>>, vector<8x48xf32>
      %c0_19 = arith.constant 0 : index
      %c0_20 = arith.constant 0 : index
      %c0_21 = arith.constant 0 : index
      %28 = vector.load %arg2[%c0_19, %c0_20, %c0_21] : memref<1x1x48xf32, #tpu.memory_space<vmem>>, vector<1x1x48xf32>
      %29 = vector.shape_cast %28 : vector<1x1x48xf32> to vector<1x48xf32>
      %30 = vector.broadcast %29 : vector<1x48xf32> to vector<8x48xf32>
      %31 = arith.mulf %27, %30 : vector<8x48xf32>
      %32 = arith.mulf %31, %31 : vector<8x48xf32>
      %cst_22 = arith.constant dense<0.000000e+00> : vector<8xf32>
      %33 = vector.multi_reduction <add>, %32, %cst_22 [1] : vector<8x48xf32> to vector<8xf32>
      %34 = vector.shape_cast %33 : vector<8xf32> to vector<8x1xf32>
      %cst_23 = arith.constant 9.99999993E-9 : f32
      %35 = vector.broadcast %cst_23 : f32 to vector<8x1xf32>
      %36 = arith.addf %34, %35 : vector<8x1xf32>
      %37 = math.rsqrt %36 : vector<8x1xf32>
      %38 = vector.broadcast %37 : vector<8x1xf32> to vector<8x48xf32>
      %39 = arith.mulf %31, %38 : vector<8x48xf32>
      %40 = arith.truncf %39 : vector<8x48xf32> to vector<8x48xbf16>
      %c0_24 = arith.constant 0 : index
      %c0_25 = arith.constant 0 : index
      %41 = vector.load %arg9[%c0_24, %c0_25] : memref<8x48xbf16, #tpu.memory_space<vmem>>, vector<8x48xbf16>
      tpu.vector_store %arg9[%c0_24, %c0_25], %40 {strides = array<i32>} : memref<8x48xbf16, #tpu.memory_space<vmem>>, vector<8x48xbf16>,
    } else {
    }
    %c0 = arith.constant 0 : index
    %c0_1 = arith.constant 0 : index
    %3 = vector.load %arg9[%c0, %c0_1] : memref<8x48xbf16, #tpu.memory_space<vmem>>, vector<8x48xbf16>
    %c0_2 = arith.constant 0 : index
    %c0_3 = arith.constant 0 : index
    %c0_4 = arith.constant 0 : index
    %4 = vector.load %arg4[%c0_2, %c0_3, %c0_4] : memref<1x48x256xbf16, #tpu.memory_space<vmem>>, vector<1x48x256xbf16>
    %5 = vector.shape_cast %4 : vector<1x48x256xbf16> to vector<48x256xbf16>
    %cst = arith.constant dense<0.000000e+00> : vector<8x256xf32>
    %6 = tpu.matmul %3, %5, %cst {dimension_numbers = #tpu.dot_dimension_numbers<[1], [0], [0], [1], [0, 0, 1, 1], [], []>} : vector<8x48xbf16>, vector<48x256xbf16>, vector<8x256xf32> -> vector<8x256xf32>
    %c0_5 = arith.constant 0 : index
    %7 = memref.load %arg7[%c0_5] : memref<1xf32, #tpu.memory_space<smem>>
    %c0_6 = arith.constant 0 : index
    %c0_7 = arith.constant 0 : index
    %c0_8 = arith.constant 0 : index
    %8 = vector.load %arg5[%c0_6, %c0_7, %c0_8] : memref<1x1x256xf32, #tpu.memory_space<vmem>>, vector<1x1x256xf32>
    %9 = vector.shape_cast %8 : vector<1x1x256xf32> to vector<1x256xf32>
    %10 = vector.broadcast %7 : f32 to vector<1x256xf32>
    %11 = arith.mulf %10, %9 : vector<1x256xf32>
    %12 = vector.broadcast %11 : vector<1x256xf32> to vector<8x256xf32>
    %13 = arith.addf %6, %12 : vector<8x256xf32>
    %c0_9 = arith.constant 0 : index
    %c0_10 = arith.constant 0 : index
    %14 = vector.load %arg6[%c0_9, %c0_10] : memref<8x1xf32, #tpu.memory_space<vmem>>, vector<8x1xf32>
    %15 = vector.broadcast %14 : vector<8x1xf32> to vector<8x256xf32>
    %16 = arith.addf %13, %15 : vector<8x256xf32>
    %cst_11 = arith.constant 0.000000e+00 : f32
    %17 = vector.broadcast %cst_11 : f32 to vector<8x256xf32>
    %18 = arith.cmpf oge, %16, %17 : vector<8x256xf32>
    %cst_12 = arith.constant 2.000000e-01 : f32
    %19 = vector.broadcast %cst_12 : f32 to vector<8x256xf32>
    %20 = arith.mulf %19, %16 : vector<8x256xf32>
    %21 = arith.select %18, %16, %20 : vector<8x256xi1>, vector<8x256xf32>
    %cst_13 = arith.constant 1.41421354 : f32
    %22 = vector.broadcast %cst_13 : f32 to vector<8x256xf32>
    %23 = arith.mulf %21, %22 : vector<8x256xf32>
    %c0_14 = arith.constant 0 : index
    %c0_15 = arith.constant 0 : index
    %c0_16 = arith.constant 0 : index
    %24 = vector.load %arg8[%c0_14, %c0_15, %c0_16] : memref<1x8x256xf32, #tpu.memory_space<vmem>>, vector<1x8x256xf32>
    %25 = vector.shape_cast %24 : vector<1x8x256xf32> to vector<8x256xf32>
    %26 = vector.shape_cast %23 : vector<8x256xf32> to vector<1x8x256xf32>
    tpu.vector_store %arg8[%c0_14, %c0_15, %c0_16], %26 {strides = array<i32>} : memref<1x8x256xf32, #tpu.memory_space<vmem>>, vector<1x8x256xf32>,
    return
  }
  func.func @transform_0(%arg0: i32, %arg1: i32) -> (i32, i32, i32) {
    %c0_i32 = arith.constant 0 : i32
    %c0_i32_0 = arith.constant 0 : i32
    %c0_i32_1 = arith.constant 0 : i32
    return %arg0, %c0_i32, %c0_i32_0 : i32, i32, i32
  }
  func.func @transform_1(%arg0: i32, %arg1: i32) -> (i32, i32) {
    %c0_i32 = arith.constant 0 : i32
    %c0_i32_0 = arith.constant 0 : i32
    %c0_i32_1 = arith.constant 0 : i32
    return %c0_i32, %c0_i32_0 : i32, i32
  }
  func.func @transform_2(%arg0: i32, %arg1: i32) -> (i32, i32, i32) {
    %c0_i32 = arith.constant 0 : i32
    %c0_i32_0 = arith.constant 0 : i32
    return %arg0, %c0_i32, %arg1 : i32, i32, i32
  }
  func.func @transform_3(%arg0: i32, %arg1: i32) -> (i32, i32, i32) {
    %c0_i32 = arith.constant 0 : i32
    %c0_i32_0 = arith.constant 0 : i32
    return %arg0, %c0_i32, %arg1 : i32, i32, i32
  }
  func.func @transform_4(%arg0: i32, %arg1: i32) -> (i32, i32) {
    %c0_i32 = arith.constant 0 : i32
    %c0_i32_0 = arith.constant 0 : i32
    %c0_i32_1 = arith.constant 0 : i32
    return %c0_i32, %c0_i32_0 : i32, i32
  }
  func.func @transform_5(%arg0: i32, %arg1: i32) -> i32 {
    %c0_i32 = arith.constant 0 : i32
    %c0_i32_0 = arith.constant 0 : i32
    return %c0_i32 : i32
  }
  func.func @transform_6(%arg0: i32, %arg1: i32) -> (i32, i32, i32) {
    %c0_i32 = arith.constant 0 : i32
    %c0_i32_0 = arith.constant 0 : i32
    return %arg0, %c0_i32, %arg1 : i32, i32, i32
  }
}

module attributes {stable_mosaic.version = 11 : i64} {
  func.func @styled_conv_kernel(%arg0: i32, %arg1: i32, %arg2: memref<1x1x48xf32, #tpu.memory_space<vmem>>, %arg3: memref<8x48xf32, #tpu.memory_space<vmem>>, %arg4: memref<1x48x256xbf16, #tpu.memory_space<vmem>>, %arg5: memref<1x1x256xf32, #tpu.memory_space<vmem>>, %arg6: memref<8x1xf32, #tpu.memory_space<vmem>>, %arg7: memref<1xf32, #tpu.memory_space<smem>>, %arg8: memref<1x8x256xf32, #tpu.memory_space<vmem>>, %arg9: memref<8x48xbf16, #tpu.memory_space<vmem>>) attributes {dimension_semantics = [#tpu.dimension_semantics<parallel>, #tpu.dimension_semantics<arbitrary>], iteration_bounds = array<i64: 2, 1>, scalar_prefetch = 0 : i64, scratch_operands = 1 : i64, tpu.core_type = #tpu.core_type<tc>, window_params = [{transform_indices = @transform_0, window_bounds = array<i64: 1, 1, 48>}, {pipeline_mode = #tpu.pipeline_mode<synchronous>, transform_indices = @transform_1, window_bounds = array<i64: 8, 48>}, {transform_indices = @transform_2, window_bounds = array<i64: 1, 48, 256>}, {transform_indices = @transform_3, window_bounds = array<i64: 1, 1, 256>}, {pipeline_mode = #tpu.pipeline_mode<synchronous>, transform_indices = @transform_4, window_bounds = array<i64: 8, 1>}, {transform_indices = @transform_5, window_bounds = array<i64: 1>}, {transform_indices = @transform_6, window_bounds = array<i64: 1, 8, 256>}]} {
    %c0_i32 = arith.constant 0 : i32
    %0 = arith.cmpi eq, %arg1, %c0_i32 : i32
    %1 = arith.extui %0 : i1 to i32
    %c0_i32_0 = arith.constant 0 : i32
    %2 = arith.cmpi ne, %1, %c0_i32_0 : i32
    scf.if %2 {
      %c0_17 = arith.constant 0 : index
      %c0_18 = arith.constant 0 : index
      %27 = vector.load %arg3[%c0_17, %c0_18] : memref<8x48xf32, #tpu.memory_space<vmem>>, vector<8x48xf32>
      %c0_19 = arith.constant 0 : index
      %c0_20 = arith.constant 0 : index
      %c0_21 = arith.constant 0 : index
      %28 = vector.load %arg2[%c0_19, %c0_20, %c0_21] : memref<1x1x48xf32, #tpu.memory_space<vmem>>, vector<1x1x48xf32>
      %29 = vector.shape_cast %28 : vector<1x1x48xf32> to vector<1x48xf32>
      %30 = vector.broadcast %29 : vector<1x48xf32> to vector<8x48xf32>
      %31 = arith.mulf %27, %30 : vector<8x48xf32>
      %32 = arith.mulf %31, %31 : vector<8x48xf32>
      %cst_22 = arith.constant dense<0.000000e+00> : vector<8xf32>
      %33 = vector.multi_reduction <add>, %32, %cst_22 [1] : vector<8x48xf32> to vector<8xf32>
      %34 = vector.shape_cast %33 : vector<8xf32> to vector<8x1xf32>
      %cst_23 = arith.constant 9.99999993E-9 : f32
      %35 = vector.broadcast %cst_23 : f32 to vector<8x1xf32>
      %36 = arith.addf %34, %35 : vector<8x1xf32>
      %37 = math.rsqrt %36 : vector<8x1xf32>
      %38 = vector.broadcast %37 : vector<8x1xf32> to vector<8x48xf32>
      %39 = arith.mulf %31, %38 : vector<8x48xf32>
      %40 = arith.truncf %39 : vector<8x48xf32> to vector<8x48xbf16>
      %c0_24 = arith.constant 0 : index
      %c0_25 = arith.constant 0 : index
      %41 = vector.load %arg9[%c0_24, %c0_25] : memref<8x48xbf16, #tpu.memory_space<vmem>>, vector<8x48xbf16>
      tpu.vector_store %arg9[%c0_24, %c0_25], %40 {strides = array<i32>} : memref<8x48xbf16, #tpu.memory_space<vmem>>, vector<8x48xbf16>,
    } else {
    }
    %c0 = arith.constant 0 : index
    %c0_1 = arith.constant 0 : index
    %3 = vector.load %arg9[%c0, %c0_1] : memref<8x48xbf16, #tpu.memory_space<vmem>>, vector<8x48xbf16>
    %c0_2 = arith.constant 0 : index
    %c0_3 = arith.constant 0 : index
    %c0_4 = arith.constant 0 : index
    %4 = vector.load %arg4[%c0_2, %c0_3, %c0_4] : memref<1x48x256xbf16, #tpu.memory_space<vmem>>, vector<1x48x256xbf16>
    %5 = vector.shape_cast %4 : vector<1x48x256xbf16> to vector<48x256xbf16>
    %cst = arith.constant dense<0.000000e+00> : vector<8x256xf32>
    %6 = tpu.matmul %3, %5, %cst {dimension_numbers = #tpu.dot_dimension_numbers<[1], [0], [0], [1], [0, 0, 1, 1], [], []>} : vector<8x48xbf16>, vector<48x256xbf16>, vector<8x256xf32> -> vector<8x256xf32>
    %c0_5 = arith.constant 0 : index
    %7 = memref.load %arg7[%c0_5] : memref<1xf32, #tpu.memory_space<smem>>
    %c0_6 = arith.constant 0 : index
    %c0_7 = arith.constant 0 : index
    %c0_8 = arith.constant 0 : index
    %8 = vector.load %arg5[%c0_6, %c0_7, %c0_8] : memref<1x1x256xf32, #tpu.memory_space<vmem>>, vector<1x1x256xf32>
    %9 = vector.shape_cast %8 : vector<1x1x256xf32> to vector<1x256xf32>
    %10 = vector.broadcast %7 : f32 to vector<1x256xf32>
    %11 = arith.mulf %10, %9 : vector<1x256xf32>
    %12 = vector.broadcast %11 : vector<1x256xf32> to vector<8x256xf32>
    %13 = arith.addf %6, %12 : vector<8x256xf32>
    %c0_9 = arith.constant 0 : index
    %c0_10 = arith.constant 0 : index
    %14 = vector.load %arg6[%c0_9, %c0_10] : memref<8x1xf32, #tpu.memory_space<vmem>>, vector<8x1xf32>
    %15 = vector.broadcast %14 : vector<8x1xf32> to vector<8x256xf32>
    %16 = arith.addf %13, %15 : vector<8x256xf32>
    %cst_11 = arith.constant 0.000000e+00 : f32
    %17 = vector.broadcast %cst_11 : f32 to vector<8x256xf32>
    %18 = arith.cmpf oge, %16, %17 : vector<8x256xf32>
    %cst_12 = arith.constant 2.000000e-01 : f32
    %19 = vector.broadcast %cst_12 : f32 to vector<8x256xf32>
    %20 = arith.mulf %19, %16 : vector<8x256xf32>
    %21 = arith.select %18, %16, %20 : vector<8x256xi1>, vector<8x256xf32>
    %cst_13 = arith.constant 1.41421354 : f32
    %22 = vector.broadcast %cst_13 : f32 to vector<8x256xf32>
    %23 = arith.mulf %21, %22 : vector<8x256xf32>
    %c0_14 = arith.constant 0 : index
    %c0_15 = arith.constant 0 : index
    %c0_16 = arith.constant 0 : index
    %24 = vector.load %arg8[%c0_14, %c0_15, %c0_16] : memref<1x8x256xf32, #tpu.memory_space<vmem>>, vector<1x8x256xf32>
    %25 = vector.shape_cast %24 : vector<1x8x256xf32> to vector<8x256xf32>
    %26 = vector.shape_cast %23 : vector<8x256xf32> to vector<1x8x256xf32>
    tpu.vector_store %arg8[%c0_14, %c0_15, %c0_16], %26 {strides = array<i32>} : memref<1x8x256xf32, #tpu.memory_space<vmem>>, vector<1x8x256xf32>,
    return
  }
  func.func @transform_0(%arg0: i32, %arg1: i32) -> (i32, i32, i32) {
    %c0_i32 = arith.constant 0 : i32
    %c0_i32_0 = arith.constant 0 : i32
    %c0_i32_1 = arith.constant 0 : i32
    return %arg0, %c0_i32, %c0_i32_0 : i32, i32, i32
  }
  func.func @transform_1(%arg0: i32, %arg1: i32) -> (i32, i32) {
    %c0_i32 = arith.constant 0 : i32
    %c0_i32_0 = arith.constant 0 : i32
    %c0_i32_1 = arith.constant 0 : i32
    return %c0_i32, %c0_i32_0 : i32, i32
  }
  func.func @transform_2(%arg0: i32, %arg1: i32) -> (i32, i32, i32) {
    %c0_i32 = arith.constant 0 : i32
    %c0_i32_0 = arith.constant 0 : i32
    return %arg0, %c0_i32, %arg1 : i32, i32, i32
  }
  func.func @transform_3(%arg0: i32, %arg1: i32) -> (i32, i32, i32) {
    %c0_i32 = arith.constant 0 : i32
    %c0_i32_0 = arith.constant 0 : i32
    return %arg0, %c0_i32, %arg1 : i32, i32, i32
  }
  func.func @transform_4(%arg0: i32, %arg1: i32) -> (i32, i32) {
    %c0_i32 = arith.constant 0 : i32
    %c0_i32_0 = arith.constant 0 : i32
    %c0_i32_1 = arith.constant 0 : i32
    return %c0_i32, %c0_i32_0 : i32, i32
  }
  func.func @transform_5(%arg0: i32, %arg1: i32) -> i32 {
    %c0_i32 = arith.constant 0 : i32
    %c0_i32_0 = arith.constant 0 : i32
    return %c0_i32 : i32
  }
  func.func @transform_6(%arg0: i32, %arg1: i32) -> (i32, i32, i32) {
    %c0_i32 = arith.constant 0 : i32
    %c0_i32_0 = arith.constant 0 : i32
    return %arg0, %c0_i32, %arg1 : i32, i32, i32
  }
}

</mosaic_0001>

<bundles_post_ra>
// kernel: tpu_custom_call.1
= control target key start
LH: loop header
LB: loop body
LE: loop exit
PB: predicated region body
PF: predicated region fallthrough
CT: control target
= control target key end

     0   :  { %s1056_s0 = inlined_call_operand.vmem [shape: f32[2,1,48], index: 0, kind: input, shape index: {}]   ;;  %s1057_s1 = inlined_call_operand.vmem [shape: f32[8,48], index: 1, kind: input, shape index: {}]   ;;  %s1058_s2 = inlined_call_operand.hbm [shape: bf16[2,48,256], index: 2, kind: input, shape index: {}]   ;;  %s1059_s3 = inlined_call_operand.vmem [shape: f32[2,1,256], index: 3, kind: input, shape index: {}]   ;;  %s1060_s4 = inlined_call_operand.vmem [shape: f32[8,1], index: 4, kind: input, shape index: {}]   ;;  %s1061_s5 = inlined_call_operand.<no memory space> [shape: f32[1], index: 5, kind: input, shape index: {}]   ;;  %s1062_s6 = inlined_call_operand.hbm [shape: f32[2,8,256], index: 6, kind: output, shape index: {}]  }
   0x1   :  { %11 = sst [smem:[#allocation3]] %s1061_s5 }
   0x2   :  { %12 = vsyncpa [#allocation5], 0 }
   0x3   :  { %14 = vsyncpa [#allocation5 + $0x1], 0 }
   0x4   :  { %15 = vsyncpa [#allocation6], 0 }
   0x5   :  { %17 = vsyncpa [#allocation6 + $0x1], 0  ;;  %s862_s23 = smov 0   ;;  %s864_s24 = smov 0  }
   0x6   :  { %s866_s25 = smov 0   ;;  %s868_s26 = smov 0  }
   0x7   :  { %s870_s27 = smov 0   ;;  %s872_s28 = smov 0  }
   0x8 LB: > { %s603_s5 = sadd.s32 4294967295, %s817_s28   ;;  %s604_s29 = sadd.s32 4294967294, %s817_s28   ;;  %s817_s28 = sphi %s872_s28, %s23_s28   ;;  %s813_s27 = sphi %s870_s27, %s1077_s27   ;;  %s809_s26 = sphi %s868_s26, %s1076_s26   ;;  %s805_s25 = sphi %s866_s25, %s1075_s25   ;;  %s801_s24 = sphi %s864_s24, %s1074_s24   ;;  %s797_s23 = sphi %s862_s23, %s1073_s23  }
   0x9   : > { %s35_s30 = sadd.s32 1, %s813_s27  ;;  %s91_s7 = sadd.s32 1, %s805_s25 }
   0xa   : > { %p37_p0 = scmp.ge.s32.totalorder %s35_s30, 2  ;;  %p98_p1 = scmp.ne.s32.totalorder %s805_s25, %s801_s24 }
   0xb   : > { %p99_p2 = scmp.eq.s32.totalorder %s817_s28, 0  ;;  %p104_p3 = scmp.ne.s32.totalorder %s801_s24, %s797_s23 }
   0xc   : > { %s1079_s30 = smov (%p37_p0, %s35_s30), 0  ;;  %p105_p5 = scmp.eq.s32.totalorder %s603_s5, 0 }
   0xd   : > { %p903_p4 = por %p99_p2, %p98_p1  ;;  %s86_s9 = ssub.s32 %s813_s27, %s1079_s30 }
   0xe   : > { %p200_p6 = scmp.eq.s32.totalorder %s603_s5, 1  ;;  %p89_p7 = scmp.eq.s32.totalorder %s86_s9, 0 }
   0xf   : > { %p909_p8 = por %p105_p5, %p104_p3  ;;  %p206_p10 = scmp.eq.s32.totalorder %s604_s29, 1 }
  0x10   : > { %p913_p9 = por %p200_p6, %p98_p1  ;;  %p640_p13 = scmp.lt.s32.totalorder %s817_s28, 2 }
  0x11   : > { %s918_s12 = scalar_select %p89_p7, %s805_s25, %s91_s7  }
  0x12   : > { %s1066_s11 = scalar_select %p913_p9, 1, 0 }
  0x13   : > { %p920_p11 = por %p206_p10, %p104_p3  ;;  %s241_s14 = sand.u32 1, %s805_s25  }
  0x14   : > { %s625_s15 = smul.u32 48, %s241_s14  ;;  %p930_p0 = pnand %p640_p13, %p903_p4 }
  0x15   : > { %s1067_s13 = scalar_select %p920_p11, 1, 0 }
  0x16   : > { %s626_s16 = smul.u32 768, %s813_s27  ;;  %s245_s21 = scalar_lea.vmem [#allocation4], %s625_s15 }
  0x17   : > { %s254_s22 = sshll.u32 %s245_s21, 4  ;;  %s942_s5 = scalar_lea.sflag [#allocation5], %s241_s14  ;;  %s939_s22 = int_to_ptr.vmem [resolvable:$true] %s254_s22 }
  0x18   : > { %s937_s20 = scalar_lea.hbm %s1058_s2, %s626_s16  ;;  %p707_p3 = pneg %p930_p0 }
  0x19   : > { %s705_s29 = scalar_lea.hbm %s937_s20, 768  ;;  %s710_s9 = scalar_lea.hbm %s1058_s2, 1536 }
  0x1a   : > { %p706_p2 = scmp.ne.s32.totalorder %s937_s20, %s705_s29  ;;  %p711_p6 = scmp.lt.u32.totalorder %s937_s20, %s1058_s2 }
  0x1b   : > { %p712_p7 = scmp.lt.u32.totalorder %s710_s9, %s705_s29  ;;  %p714_p13 = scmp.lt.u32.totalorder %s705_s29, %s937_s20 }
  0x1c   : > { %p708_p4 = pnand %p707_p3, %p706_p2 }
  0x1d   : > { %p713_p10 = por %p712_p7, %p711_p6 }
  0x1e   : > { %p709_p5 = pneg %p708_p4 }
  0x1f   : > { %p715_p12 = por %p714_p13, %p713_p10 }
  0x21   : > { %p716_p1 = pnand %p715_p12, %p709_p5 }
  0x23   : > { %719 = shalt.err (!%p716_p1)
}
  0x24   : > { %s720_s14 = scalar_lea.vmem %s939_s22, 768  ;;  %s819_s18 = smov [#allocation4]  }
  0x25   : > { %p721_p2 = scmp.ne.s32.totalorder %s939_s22, %s720_s14  ;;  %s725_s19 = sshll.u32 %s819_s18, 4  ;;  %s726_s19 = int_to_ptr.vmem [resolvable:$false] %s725_s19 }
  0x26   : > { %s727_s21 = scalar_lea.vmem %s726_s19, 1536  ;;  %p728_p9 = scmp.lt.s32.totalorder %s939_s22, %s726_s19 }
  0x27   : > { %p723_p4 = pnand %p721_p2, %p707_p3  ;;  %p729_p6 = scmp.lt.s32.totalorder %s727_s21, %s720_s14 }
  0x29   : > { %p724_p11 = pneg %p723_p4  ;;  %p730_p7 = por %p729_p6, %p728_p9 }
  0x2b   : > { %p731_p10 = pnand %p730_p7, %p724_p11 }
  0x2d   : > { %734 = shalt.err (!%p731_p10)
}
  0x2e   : > { %s820_s29 = smov 128   ;;  %s821_s7 = smov 8  }
  0x2f   : > { %635 = dma.hbm_to_vmem [thread:$0]  (!%p930_p0), %s937_s20, 768, %s939_s22, %s942_s5, %s820_s29, %s820_s29, %s821_s7  }
  0x30   : > { %p274_p12 = scmp.lt.s32.totalorder %s817_s28, 3  ;;  %p1069_p1 = scmp.ge.s32.totalorder %s817_s28, 1 }
  0x32   : > { %p275_p3 = pnand %p1069_p1, %p274_p12 }
  0x33   : > { %s974_s8 = sand.u32 (!%p275_p3), 1, %s801_s24  }
  0x34   : > { %278 = sbr.rel (%p275_p3) target bundleno = 474 (0x1da), region = 44  ;;  %s281_s16 = scalar_lea.sflag (!%p275_p3), [#allocation5], %s974_s8 }
  0x35   : > { %s627_s9 = smul.u32 (!%p275_p3), 48, %s974_s8 }
  0x37   : > { %s284_s15 = scalar_lea.vmem (!%p275_p3), [#allocation4], %s627_s9 }
  0x3b   : > { %788 = dma.done.wait (%p909_p8), %s281_s16, 768  }
  0x3c   : > { %790 = vsyncadd (%p909_p8), %s281_s16, 4294966528  ;;  %p324_p9 = scmp.lt.s32.totalorder %s809_s26, 1  ;;  %v343_v0 = vld [vmem:[%s1057_s1] sm:$0xff]  ;;  %vm353_vm0 = vcmask 392192   ;;  %v822_v11 = vmov 0   ;;  %vm361_vm1 = vcmask 388096   ;;  %v375_v19 = vlaneseq }
  0x3d   : > { %v694_v5 = vld [vmem:[%s284_s15 + $0x4] ss:$8 sps:$4 sm:$0xff]   ;;  %v696_v6 = vld [vmem:[%s284_s15] ss:$8 sps:$4 sm:$0xff]   ;;  %v697_v7 = vld [vmem:[%s284_s15 + $0x14] ss:$8 sps:$4 sm:$0xff]   ;;  %451 = vmatprep.mubr.bf16.mxu0 %v822_v11  ;;  %693 = vset.pattern.permute.xlu0 %v822_v11 }
  0x3e   : > { %s984_s17 = scalar_select %p324_p9, %s809_s26, 1  ;;  %419 = vmatprep.subr.bf16.mxu0 %v694_v5  ;;  %v699_v8 = vld [vmem:[%s284_s15 + $0x10] ss:$8 sps:$4 sm:$0xff]   ;;  %v700_v9 = vld [vmem:[%s284_s15 + $0x24] ss:$8 sps:$4 sm:$0xff]   ;;  %v376_v20 = vshrl.u32 %v375_v19, 7 }
  0x3f   : > { %420 = vmatpush1.bf16.msra.mxu0 %v696_v6  ;;  %v702_v10 = vld [vmem:[%s284_s15 + $0x20] ss:$8 sps:$4 sm:$0xff]   ;;  %s370_s21 = sld [smem:[#allocation3]]  ;;  %s609_s15 = sshll.u32 %s974_s8, 4 }
  0x40   : > { %s326_s5 = scalar_lea.vmem %s1056_s0, %s984_s17  ;;  %421 = vmatprep.subr.bf16.mxu0 %v697_v7  ;;  %v460_v12 = vld [vmem:[%s1060_s4] sm:$0xff]  ;;  %s610_s29 = sshll.u32 %s984_s17, 1  ;;  %v377_v24 = vsub.s32 0, %v376_v20  ;;  %v381_v25 = vsub.s32 1, %v376_v20 }
  0x41   : > { %v611_v1 = vld [vmem:[%s326_s5] ss:$0 sm:$0xff]  ;;  %s335_s16 = scalar_lea.vmem %s1059_s3, %s610_s29  ;;  %s624_s17 = sshll.u32 %s809_s26, 8 }
  0x42   : > { %v351_v2 = vmul.f32 %v611_v1, %v343_v0  ;;  %v371_v21 = vld [vmem:[%s335_s16] sm:$0x3]  ;;  %s323_s20 = scalar_lea.vmem [#allocation7], %s609_s15  ;;  %s1007_s18 = scalar_lea.hbm %s1062_s6, %s624_s17 }
  0x43   : > { %422 = vmatpush1.bf16.msra.mxu0 %v699_v8  ;;  %s495_s22 = sshll.u32 %s323_s20, 4  ;;  %s479_s10 = scalar_lea.sflag [#allocation6], %s974_s8  ;;  %s1009_s22 = int_to_ptr.vmem [resolvable:$true] %s495_s22 }
  0x44   : > { %v352_v3 = vmul.f32 %v351_v2, %v351_v2  ;;  %423 = vmatprep.subr.bf16.mxu0 %v700_v9  ;;  %s735_s26 = scalar_lea.vmem %s1009_s22, 256  ;;  %p1070_p11 = scmp.ne.s32.totalorder %s1066_s11, 0 }
  0x45   : > { %v372_v22 = vstv %s370_s21  ;;  %p736_p8 = scmp.ne.s32.totalorder %s1009_s22, %s735_s26  ;;  %s823_s19 = smov [#allocation7]  }
  0x46   : > { %v354_v4 = vsel %vm353_vm0, %v352_v3, 0.0  ;;  %v373_v23 = vmul.f32 %v372_v22, %v371_v21  ;;  %s739_s21 = sshll.u32 %s823_s19, 4  ;;  %s740_s21 = int_to_ptr.vmem [resolvable:$false] %s739_s21 }
  0x47   : > { %355 = vadd.xlane.f32.xlu0 %v354_v4  ;;  %424 = vmatpush1.bf16.msra.mxu0 %v702_v10  ;;  %p737_p0 = pnand %p736_p8, %p1070_p11  ;;  %s741_s29 = scalar_lea.vmem %s740_s21, 512 }
  0x48   : > { %v378_v26 = vrot.slane %v373_v23, %v377_v24  ;;  %v382_v27 = vrot.slane %v373_v23, %v381_v25  ;;  %p742_p13 = scmp.lt.s32.totalorder %s1009_s22, %s740_s21  ;;  %p743_p2 = scmp.lt.s32.totalorder %s741_s29, %s735_s26 }
  0x49   : > { %p738_p5 = pneg %p737_p0 }
  0x4a   : > { %p744_p4 = por %p743_p2, %p742_p13 }
  0x4c   : > { %p745_p6 = pnand %p744_p4, %p738_p5 }
  0x5d   : > { %463 = vperm.xlu0 %693, %v460_v12  }
  0xd4   : > { %v356_v13 = vpop.xlane.xlu0 %355 }
  0xd5   : > { %v357_v14 = vadd.f32 1e-08, %v356_v13 }
  0xd7   : > { %703 = vrsqrt.f32 %v357_v14 }
  0xdc   : > { %v464_v29 = vpop.permute.xlu0 %463 }
  0xe1   : > { %v704_v15 = vpop.eup %703 }
  0xe2   : > { %v359_v16 = vmul.f32 %v704_v15, %v351_v2 }
  0xe4   : > { %v360_v17 = vpack.c.bf16 %v359_v16, %v359_v16 }
  0xe6   : > { %362 = vst.msk [vmem:[#allocation2] sm:$0xf] %vm361_vm1, %v360_v17 }
  0xed   : > { %v363_v18 = vld [vmem:[#allocation2] sm:$0xf] }
  0xee   : > { %618 = vmatmul.mubr.msk.bf16.vlgmr.msra.gmra.mrb[0].mxu0 %vm353_vm0, %v363_v18 }
 0x1c1   : > { %v453_v28 = vpop.f32.mrb[0].mxu0 }
 0x1c2   : > { %v454_v30 = vadd.f32 %v453_v28, %v378_v26  ;;  %v455_v31 = vpop.f32.mrb[1].mxu0 }
 0x1c3   : > { %v456_v32 = vadd.f32 %v455_v31, %v382_v27  ;;  %v457_v33 = vpop.f32.mrb[2].mxu0 }
 0x1c4   : > { %v466_v34 = vadd.f32 %v464_v29, %v454_v30  ;;  %v458_v35 = vpop.f32.mrb[3].mxu0 }
 0x1c5   : > { %v467_v36 = vadd.f32 %v464_v29, %v456_v32 }
 0x1c6   : > { %vm468_vm2 = vcmp.ge.f32.partialorder %v466_v34, 0.0  ;;  %v470_v37 = vmul.f32 0.2, %v466_v34 }
 0x1c7   : > { %vm469_vm3 = vcmp.ge.f32.partialorder %v467_v36, 0.0  ;;  %v471_v38 = vmul.f32 0.2, %v467_v36 }
 0x1c8   : > { %v472_v39 = vsel %vm468_vm2, %v466_v34, %v470_v37 }
 0x1c9   : > { %v473_v40 = vsel %vm469_vm3, %v467_v36, %v471_v38  ;;  %v474_v41 = vmul.f32 1.4142135, %v472_v39 }
 0x1ca   : > { %v475_v42 = vmul.f32 1.4142135, %v473_v40 }
 0x1cb   : > { %476 = vst [vmem:[%s323_s20] sm:$0xff] %v474_v41 }
 0x1cc   : > { %477 = vst [vmem:[%s323_s20 + $0x8] sm:$0xff] %v475_v42 }
 0x1cd   : > { %748 = shalt.err (!%p745_p6)
}
 0x1ce   : > { %s749_s8 = scalar_lea.hbm %s1007_s18, 256  ;;  %s753_s16 = scalar_lea.hbm %s1062_s6, 512 }
 0x1cf   : > { %p750_p7 = scmp.ne.s32.totalorder %s1007_s18, %s749_s8  ;;  %p754_p1 = scmp.lt.u32.totalorder %s1007_s18, %s1062_s6 }
 0x1d0   : > { %p755_p3 = scmp.lt.u32.totalorder %s753_s16, %s749_s8  ;;  %p757_p8 = scmp.lt.u32.totalorder %s749_s8, %s1007_s18 }
 0x1d1   : > { %p751_p10 = pnand %p750_p7, %p1070_p11 }
 0x1d2   : > { %p756_p9 = por %p755_p3, %p754_p1 }
 0x1d3   : > { %p752_p12 = pneg %p751_p10 }
 0x1d4   : > { %p758_p0 = por %p757_p8, %p756_p9 }
 0x1d6   : > { %p759_p5 = pnand %p758_p0, %p752_p12 }
 0x1d8   : > { %762 = shalt.err (!%p759_p5)
}
 0x1d9   : > { %630 = dma.vmem_to_hbm [thread:$0]  (%p1070_p11), %s1009_s22, 256, %s1007_s18, %s479_s10  }
 0x1da PF: > { %s507_s20 = sand.u32 1, %s797_s23   ;;  %p1071_p13 = scmp.ne.s32.totalorder %s1067_s13, 0 }
 0x1db   : > { %p1072_p2 = scmp.ge.s32.totalorder %s817_s28, 2  ;;  %s508_s5 = scalar_lea.sflag [#allocation6], %s507_s20 }
 0x1dd   : > { %p637_p4 = pnand %p1072_p2, %p1071_p13 }
 0x1df   : > { %792 = dma.done.wait (!%p637_p4), %s508_s5, 256  }
 0x1e0   : > { %794 = vsyncadd (!%p637_p4), %s508_s5, 4294967040  ;;  %s23_s28 = sadd.s32 1, %s817_s28   ;;  %s1073_s23 = smov %s801_s24 }
 0x1e1   : > { %p20_p6 = scmp.ge.s32.totalorder %s23_s28, 4   ;;  %s1074_s24 = smov %s805_s25 }
 0x1e2   : > { %s1075_s25 = smov %s918_s12  ;;  %s1076_s26 = smov %s813_s27 }
 0x1e3   : > { %s1077_s27 = smov %s1079_s30  ;;  %22 = sbr.rel (!%p20_p6) target bundleno = 8 (0x8), region = 99 }
 0x1ea   :  { %513 = vsyncpa [#allocation5], 1 }
 0x1eb   :  { %515 = vsyncpa [#allocation5 + $0x1], 1 }
 0x1ec   :  { %516 = vsyncpa [#allocation6], 1 }
 0x1ed   :  { %518 = vsyncpa [#allocation6 + $0x1], 1 }

// kernel: tpu_custom_call.1
= control target key start
LH: loop header
LB: loop body
LE: loop exit
PB: predicated region body
PF: predicated region fallthrough
CT: control target
= control target key end

     0   :  { %s1056_s0 = inlined_call_operand.vmem [shape: f32[2,1,48], index: 0, kind: input, shape index: {}]   ;;  %s1057_s1 = inlined_call_operand.vmem [shape: f32[8,48], index: 1, kind: input, shape index: {}]   ;;  %s1058_s2 = inlined_call_operand.hbm [shape: bf16[2,48,256], index: 2, kind: input, shape index: {}]   ;;  %s1059_s3 = inlined_call_operand.vmem [shape: f32[2,1,256], index: 3, kind: input, shape index: {}]   ;;  %s1060_s4 = inlined_call_operand.vmem [shape: f32[8,1], index: 4, kind: input, shape index: {}]   ;;  %s1061_s5 = inlined_call_operand.<no memory space> [shape: f32[1], index: 5, kind: input, shape index: {}]   ;;  %s1062_s6 = inlined_call_operand.hbm [shape: f32[2,8,256], index: 6, kind: output, shape index: {}]  }
   0x1   :  { %11 = sst [smem:[#allocation3]] %s1061_s5 }
   0x2   :  { %12 = vsyncpa [#allocation5], 0 }
   0x3   :  { %14 = vsyncpa [#allocation5 + $0x1], 0 }
   0x4   :  { %15 = vsyncpa [#allocation6], 0 }
   0x5   :  { %17 = vsyncpa [#allocation6 + $0x1], 0  ;;  %s862_s23 = smov 0   ;;  %s864_s24 = smov 0  }
   0x6   :  { %s866_s25 = smov 0   ;;  %s868_s26 = smov 0  }
   0x7   :  { %s870_s27 = smov 0   ;;  %s872_s28 = smov 0  }
   0x8 LB: > { %s603_s5 = sadd.s32 4294967295, %s817_s28   ;;  %s604_s29 = sadd.s32 4294967294, %s817_s28   ;;  %s817_s28 = sphi %s872_s28, %s23_s28   ;;  %s813_s27 = sphi %s870_s27, %s1077_s27   ;;  %s809_s26 = sphi %s868_s26, %s1076_s26   ;;  %s805_s25 = sphi %s866_s25, %s1075_s25   ;;  %s801_s24 = sphi %s864_s24, %s1074_s24   ;;  %s797_s23 = sphi %s862_s23, %s1073_s23  }
   0x9   : > { %s35_s30 = sadd.s32 1, %s813_s27  ;;  %s91_s7 = sadd.s32 1, %s805_s25 }
   0xa   : > { %p37_p0 = scmp.ge.s32.totalorder %s35_s30, 2  ;;  %p98_p1 = scmp.ne.s32.totalorder %s805_s25, %s801_s24 }
   0xb   : > { %p99_p2 = scmp.eq.s32.totalorder %s817_s28, 0  ;;  %p104_p3 = scmp.ne.s32.totalorder %s801_s24, %s797_s23 }
   0xc   : > { %s1079_s30 = smov (%p37_p0, %s35_s30), 0  ;;  %p105_p5 = scmp.eq.s32.totalorder %s603_s5, 0 }
   0xd   : > { %p903_p4 = por %p99_p2, %p98_p1  ;;  %s86_s9 = ssub.s32 %s813_s27, %s1079_s30 }
   0xe   : > { %p200_p6 = scmp.eq.s32.totalorder %s603_s5, 1  ;;  %p89_p7 = scmp.eq.s32.totalorder %s86_s9, 0 }
   0xf   : > { %p909_p8 = por %p105_p5, %p104_p3  ;;  %p206_p10 = scmp.eq.s32.totalorder %s604_s29, 1 }
  0x10   : > { %p913_p9 = por %p200_p6, %p98_p1  ;;  %p640_p13 = scmp.lt.s32.totalorder %s817_s28, 2 }
  0x11   : > { %s918_s12 = scalar_select %p89_p7, %s805_s25, %s91_s7  }
  0x12   : > { %s1066_s11 = scalar_select %p913_p9, 1, 0 }
  0x13   : > { %p920_p11 = por %p206_p10, %p104_p3  ;;  %s241_s14 = sand.u32 1, %s805_s25  }
  0x14   : > { %s625_s15 = smul.u32 48, %s241_s14  ;;  %p930_p0 = pnand %p640_p13, %p903_p4 }
  0x15   : > { %s1067_s13 = scalar_select %p920_p11, 1, 0 }
  0x16   : > { %s626_s16 = smul.u32 768, %s813_s27  ;;  %s245_s21 = scalar_lea.vmem [#allocation4], %s625_s15 }
  0x17   : > { %s254_s22 = sshll.u32 %s245_s21, 4  ;;  %s942_s5 = scalar_lea.sflag [#allocation5], %s241_s14  ;;  %s939_s22 = int_to_ptr.vmem [resolvable:$true] %s254_s22 }
  0x18   : > { %s937_s20 = scalar_lea.hbm %s1058_s2, %s626_s16  ;;  %p707_p3 = pneg %p930_p0 }
  0x19   : > { %s705_s29 = scalar_lea.hbm %s937_s20, 768  ;;  %s710_s9 = scalar_lea.hbm %s1058_s2, 1536 }
  0x1a   : > { %p706_p2 = scmp.ne.s32.totalorder %s937_s20, %s705_s29  ;;  %p711_p6 = scmp.lt.u32.totalorder %s937_s20, %s1058_s2 }
  0x1b   : > { %p712_p7 = scmp.lt.u32.totalorder %s710_s9, %s705_s29  ;;  %p714_p13 = scmp.lt.u32.totalorder %s705_s29, %s937_s20 }
  0x1c   : > { %p708_p4 = pnand %p707_p3, %p706_p2 }
  0x1d   : > { %p713_p10 = por %p712_p7, %p711_p6 }
  0x1e   : > { %p709_p5 = pneg %p708_p4 }
  0x1f   : > { %p715_p12 = por %p714_p13, %p713_p10 }
  0x21   : > { %p716_p1 = pnand %p715_p12, %p709_p5 }
  0x23   : > { %719 = shalt.err (!%p716_p1)
}
  0x24   : > { %s720_s14 = scalar_lea.vmem %s939_s22, 768  ;;  %s819_s18 = smov [#allocation4]  }
  0x25   : > { %p721_p2 = scmp.ne.s32.totalorder %s939_s22, %s720_s14  ;;  %s725_s19 = sshll.u32 %s819_s18, 4  ;;  %s726_s19 = int_to_ptr.vmem [resolvable:$false] %s725_s19 }
  0x26   : > { %s727_s21 = scalar_lea.vmem %s726_s19, 1536  ;;  %p728_p9 = scmp.lt.s32.totalorder %s939_s22, %s726_s19 }
  0x27   : > { %p723_p4 = pnand %p721_p2, %p707_p3  ;;  %p729_p6 = scmp.lt.s32.totalorder %s727_s21, %s720_s14 }
  0x29   : > { %p724_p11 = pneg %p723_p4  ;;  %p730_p7 = por %p729_p6, %p728_p9 }
  0x2b   : > { %p731_p10 = pnand %p730_p7, %p724_p11 }
  0x2d   : > { %734 = shalt.err (!%p731_p10)
}
  0x2e   : > { %s820_s29 = smov 128   ;;  %s821_s7 = smov 8  }
  0x2f   : > { %635 = dma.hbm_to_vmem [thread:$0]  (!%p930_p0), %s937_s20, 768, %s939_s22, %s942_s5, %s820_s29, %s820_s29, %s821_s7  }
  0x30   : > { %p274_p12 = scmp.lt.s32.totalorder %s817_s28, 3  ;;  %p1069_p1 = scmp.ge.s32.totalorder %s817_s28, 1 }
  0x32   : > { %p275_p3 = pnand %p1069_p1, %p274_p12 }
  0x33   : > { %s974_s8 = sand.u32 (!%p275_p3), 1, %s801_s24  }
  0x34   : > { %278 = sbr.rel (%p275_p3) target bundleno = 474 (0x1da), region = 44  ;;  %s281_s16 = scalar_lea.sflag (!%p275_p3), [#allocation5], %s974_s8 }
  0x35   : > { %s627_s9 = smul.u32 (!%p275_p3), 48, %s974_s8 }
  0x37   : > { %s284_s15 = scalar_lea.vmem (!%p275_p3), [#allocation4], %s627_s9 }
  0x3b   : > { %788 = dma.done.wait (%p909_p8), %s281_s16, 768  }
  0x3c   : > { %790 = vsyncadd (%p909_p8), %s281_s16, 4294966528  ;;  %p324_p9 = scmp.lt.s32.totalorder %s809_s26, 1  ;;  %v343_v0 = vld [vmem:[%s1057_s1] sm:$0xff]  ;;  %vm353_vm0 = vcmask 392192   ;;  %v822_v11 = vmov 0   ;;  %vm361_vm1 = vcmask 388096   ;;  %v375_v19 = vlaneseq }
  0x3d   : > { %v694_v5 = vld [vmem:[%s284_s15 + $0x4] ss:$8 sps:$4 sm:$0xff]   ;;  %v696_v6 = vld [vmem:[%s284_s15] ss:$8 sps:$4 sm:$0xff]   ;;  %v697_v7 = vld [vmem:[%s284_s15 + $0x14] ss:$8 sps:$4 sm:$0xff]   ;;  %451 = vmatprep.mubr.bf16.mxu0 %v822_v11  ;;  %693 = vset.pattern.permute.xlu0 %v822_v11 }
  0x3e   : > { %s984_s17 = scalar_select %p324_p9, %s809_s26, 1  ;;  %419 = vmatprep.subr.bf16.mxu0 %v694_v5  ;;  %v699_v8 = vld [vmem:[%s284_s15 + $0x10] ss:$8 sps:$4 sm:$0xff]   ;;  %v700_v9 = vld [vmem:[%s284_s15 + $0x24] ss:$8 sps:$4 sm:$0xff]   ;;  %v376_v20 = vshrl.u32 %v375_v19, 7 }
  0x3f   : > { %420 = vmatpush1.bf16.msra.mxu0 %v696_v6  ;;  %v702_v10 = vld [vmem:[%s284_s15 + $0x20] ss:$8 sps:$4 sm:$0xff]   ;;  %s370_s21 = sld [smem:[#allocation3]]  ;;  %s609_s15 = sshll.u32 %s974_s8, 4 }
  0x40   : > { %s326_s5 = scalar_lea.vmem %s1056_s0, %s984_s17  ;;  %421 = vmatprep.subr.bf16.mxu0 %v697_v7  ;;  %v460_v12 = vld [vmem:[%s1060_s4] sm:$0xff]  ;;  %s610_s29 = sshll.u32 %s984_s17, 1  ;;  %v377_v24 = vsub.s32 0, %v376_v20  ;;  %v381_v25 = vsub.s32 1, %v376_v20 }
  0x41   : > { %v611_v1 = vld [vmem:[%s326_s5] ss:$0 sm:$0xff]  ;;  %s335_s16 = scalar_lea.vmem %s1059_s3, %s610_s29  ;;  %s624_s17 = sshll.u32 %s809_s26, 8 }
  0x42   : > { %v351_v2 = vmul.f32 %v611_v1, %v343_v0  ;;  %v371_v21 = vld [vmem:[%s335_s16] sm:$0x3]  ;;  %s323_s20 = scalar_lea.vmem [#allocation7], %s609_s15  ;;  %s1007_s18 = scalar_lea.hbm %s1062_s6, %s624_s17 }
  0x43   : > { %422 = vmatpush1.bf16.msra.mxu0 %v699_v8  ;;  %s495_s22 = sshll.u32 %s323_s20, 4  ;;  %s479_s10 = scalar_lea.sflag [#allocation6], %s974_s8  ;;  %s1009_s22 = int_to_ptr.vmem [resolvable:$true] %s495_s22 }
  0x44   : > { %v352_v3 = vmul.f32 %v351_v2, %v351_v2  ;;  %423 = vmatprep.subr.bf16.mxu0 %v700_v9  ;;  %s735_s26 = scalar_lea.vmem %s1009_s22, 256  ;;  %p1070_p11 = scmp.ne.s32.totalorder %s1066_s11, 0 }
  0x45   : > { %v372_v22 = vstv %s370_s21  ;;  %p736_p8 = scmp.ne.s32.totalorder %s1009_s22, %s735_s26  ;;  %s823_s19 = smov [#allocation7]  }
  0x46   : > { %v354_v4 = vsel %vm353_vm0, %v352_v3, 0.0  ;;  %v373_v23 = vmul.f32 %v372_v22, %v371_v21  ;;  %s739_s21 = sshll.u32 %s823_s19, 4  ;;  %s740_s21 = int_to_ptr.vmem [resolvable:$false] %s739_s21 }
  0x47   : > { %355 = vadd.xlane.f32.xlu0 %v354_v4  ;;  %424 = vmatpush1.bf16.msra.mxu0 %v702_v10  ;;  %p737_p0 = pnand %p736_p8, %p1070_p11  ;;  %s741_s29 = scalar_lea.vmem %s740_s21, 512 }
  0x48   : > { %v378_v26 = vrot.slane %v373_v23, %v377_v24  ;;  %v382_v27 = vrot.slane %v373_v23, %v381_v25  ;;  %p742_p13 = scmp.lt.s32.totalorder %s1009_s22, %s740_s21  ;;  %p743_p2 = scmp.lt.s32.totalorder %s741_s29, %s735_s26 }
  0x49   : > { %p738_p5 = pneg %p737_p0 }
  0x4a   : > { %p744_p4 = por %p743_p2, %p742_p13 }
  0x4c   : > { %p745_p6 = pnand %p744_p4, %p738_p5 }
  0x5d   : > { %463 = vperm.xlu0 %693, %v460_v12  }
  0xd4   : > { %v356_v13 = vpop.xlane.xlu0 %355 }
  0xd5   : > { %v357_v14 = vadd.f32 1e-08, %v356_v13 }
  0xd7   : > { %703 = vrsqrt.f32 %v357_v14 }
  0xdc   : > { %v464_v29 = vpop.permute.xlu0 %463 }
  0xe1   : > { %v704_v15 = vpop.eup %703 }
  0xe2   : > { %v359_v16 = vmul.f32 %v704_v15, %v351_v2 }
  0xe4   : > { %v360_v17 = vpack.c.bf16 %v359_v16, %v359_v16 }
  0xe6   : > { %362 = vst.msk [vmem:[#allocation2] sm:$0xf] %vm361_vm1, %v360_v17 }
  0xed   : > { %v363_v18 = vld [vmem:[#allocation2] sm:$0xf] }
  0xee   : > { %618 = vmatmul.mubr.msk.bf16.vlgmr.msra.gmra.mrb[0].mxu0 %vm353_vm0, %v363_v18 }
 0x1c1   : > { %v453_v28 = vpop.f32.mrb[0].mxu0 }
 0x1c2   : > { %v454_v30 = vadd.f32 %v453_v28, %v378_v26  ;;  %v455_v31 = vpop.f32.mrb[1].mxu0 }
 0x1c3   : > { %v456_v32 = vadd.f32 %v455_v31, %v382_v27  ;;  %v457_v33 = vpop.f32.mrb[2].mxu0 }
 0x1c4   : > { %v466_v34 = vadd.f32 %v464_v29, %v454_v30  ;;  %v458_v35 = vpop.f32.mrb[3].mxu0 }
 0x1c5   : > { %v467_v36 = vadd.f32 %v464_v29, %v456_v32 }
 0x1c6   : > { %vm468_vm2 = vcmp.ge.f32.partialorder %v466_v34, 0.0  ;;  %v470_v37 = vmul.f32 0.2, %v466_v34 }
 0x1c7   : > { %vm469_vm3 = vcmp.ge.f32.partialorder %v467_v36, 0.0  ;;  %v471_v38 = vmul.f32 0.2, %v467_v36 }
 0x1c8   : > { %v472_v39 = vsel %vm468_vm2, %v466_v34, %v470_v37 }
 0x1c9   : > { %v473_v40 = vsel %vm469_vm3, %v467_v36, %v471_v38  ;;  %v474_v41 = vmul.f32 1.4142135, %v472_v39 }
 0x1ca   : > { %v475_v42 = vmul.f32 1.4142135, %v473_v40 }
 0x1cb   : > { %476 = vst [vmem:[%s323_s20] sm:$0xff] %v474_v41 }
 0x1cc   : > { %477 = vst [vmem:[%s323_s20 + $0x8] sm:$0xff] %v475_v42 }
 0x1cd   : > { %748 = shalt.err (!%p745_p6)
}
 0x1ce   : > { %s749_s8 = scalar_lea.hbm %s1007_s18, 256  ;;  %s753_s16 = scalar_lea.hbm %s1062_s6, 512 }
 0x1cf   : > { %p750_p7 = scmp.ne.s32.totalorder %s1007_s18, %s749_s8  ;;  %p754_p1 = scmp.lt.u32.totalorder %s1007_s18, %s1062_s6 }
 0x1d0   : > { %p755_p3 = scmp.lt.u32.totalorder %s753_s16, %s749_s8  ;;  %p757_p8 = scmp.lt.u32.totalorder %s749_s8, %s1007_s18 }
 0x1d1   : > { %p751_p10 = pnand %p750_p7, %p1070_p11 }
 0x1d2   : > { %p756_p9 = por %p755_p3, %p754_p1 }
 0x1d3   : > { %p752_p12 = pneg %p751_p10 }
 0x1d4   : > { %p758_p0 = por %p757_p8, %p756_p9 }
 0x1d6   : > { %p759_p5 = pnand %p758_p0, %p752_p12 }
 0x1d8   : > { %762 = shalt.err (!%p759_p5)
}
 0x1d9   : > { %630 = dma.vmem_to_hbm [thread:$0]  (%p1070_p11), %s1009_s22, 256, %s1007_s18, %s479_s10  }
 0x1da PF: > { %s507_s20 = sand.u32 1, %s797_s23   ;;  %p1071_p13 = scmp.ne.s32.totalorder %s1067_s13, 0 }
 0x1db   : > { %p1072_p2 = scmp.ge.s32.totalorder %s817_s28, 2  ;;  %s508_s5 = scalar_lea.sflag [#allocation6], %s507_s20 }
 0x1dd   : > { %p637_p4 = pnand %p1072_p2, %p1071_p13 }
 0x1df   : > { %792 = dma.done.wait (!%p637_p4), %s508_s5, 256  }
 0x1e0   : > { %794 = vsyncadd (!%p637_p4), %s508_s5, 4294967040  ;;  %s23_s28 = sadd.s32 1, %s817_s28   ;;  %s1073_s23 = smov %s801_s24 }
 0x1e1   : > { %p20_p6 = scmp.ge.s32.totalorder %s23_s28, 4   ;;  %s1074_s24 = smov %s805_s25 }
 0x1e2   : > { %s1075_s25 = smov %s918_s12  ;;  %s1076_s26 = smov %s813_s27 }
 0x1e3   : > { %s1077_s27 = smov %s1079_s30  ;;  %22 = sbr.rel (!%p20_p6) target bundleno = 8 (0x8), region = 99 }
 0x1ea   :  { %513 = vsyncpa [#allocation5], 1 }
 0x1eb   :  { %515 = vsyncpa [#allocation5 + $0x1], 1 }
 0x1ec   :  { %516 = vsyncpa [#allocation6], 1 }
 0x1ed   :  { %518 = vsyncpa [#allocation6 + $0x1], 1 }

</bundles_post_ra>
